<compile_context>
chip_gen: v5e
topology: v5e:2x2
jax: 0.10.0
libtpu: 0.0.40
codegen_flags: <defaults>
</compile_context>

<pallas_src>
import math

import jax
import jax.numpy as jnp
from jax.experimental import pallas as pl
from jax.experimental.pallas import tpu as pltpu


def _self_attention_kernel(v_ref, wt_ref, o_ref, vsum_ref):
    """Grid = (batch_blocks, Lv_tiles); Lv is the innermost (reduction) axis.

    v_ref    : (Nb, tl, E)  values tile for this (batch block, Lv tile)
    wt_ref   : (E, E)       fc_out weight, already transposed + cast to f32
    o_ref    : (Nb, Lq, E)  output block (same block across the Lv axis)
    vsum_ref : (Nb, E) f32  running column-sum of V, persists across Lv steps
    """
    l = pl.program_id(1)

    @pl.when(l == 0)
    def _init():
        vsum_ref[...] = jnp.zeros_like(vsum_ref)

    # sum_l V[n, l, :] for this Lv tile (accumulated across the Lv grid axis).
    vsum_ref[...] += jnp.sum(v_ref[...].astype(jnp.float32), axis=1)

    @pl.when(l == pl.num_programs(1) - 1)
    def _finalize():
        # fc_out: y = vsum @ W^T  (W^T precomputed in the wrapper -> no per-step
        # XLU transpose / VPU cast inside the kernel).
        y = jnp.dot(vsum_ref[...], wt_ref[...],
                    preferred_element_type=jnp.float32)            # (Nb, E)
        # out[n, q, :] == y[n, :] for every query position q.
        o_ref[...] = jnp.broadcast_to(y[:, None, :], o_ref.shape).astype(o_ref.dtype)


def _pick_seq_tile(L, cap=512):
    """Largest multiple of 8 that divides L and is <= cap; else the full L."""
    if L <= cap:
        return L
    best = 0
    t = 8
    while t <= cap:
        if L % t == 0:
            best = t
        t += 8
    return best if best else L


def _pick_batch_block(N, Lq, tl, E, itemsize, budget_bytes=8 << 20):
    """Fold batches into one block while staying well under scoped VMEM."""
    per_batch = 2 * (Lq * E + tl * E) * max(itemsize, 4)  # double-buffered blocks
    nb = max(1, min(N, budget_bytes // max(per_batch, 1)))
    while N % nb:
        nb -= 1
    return nb


def self_attention_forward(query, key, values, mask, w_fc, heads):
    """Forward pass of the PyTorch SelfAttention module.

    query/key/values: (N, L, E); mask: broadcastable to (N, H, Lq, Lk);
    w_fc: (E, E) = (out_features, in_features). Returns (N, Lq, E).

    query/key/mask are accepted for API parity but — per the module's own einsum
    semantics (softmax rows sum to 1) — cannot influence the output, so they are
    never shipped to the kernel.
    """
    N, Lq, E = query.shape
    Lv = values.shape[1]
    assert heads * (E // heads) == E, "divided error"
    del key, mask  # mathematically dead in this module's forward (see file header)

    tl = _pick_seq_tile(Lv)
    assert Lv % tl == 0
    nb = _pick_batch_block(N, Lq, tl, E, jnp.dtype(values.dtype).itemsize)
    assert N % nb == 0

    # Hoist fc_out weight transpose + cast out of the kernel (done once).
    wt = w_fc.T.astype(jnp.float32)

    # NOTE: for production shapes keep E a multiple of 128 so output stores are
    # lane-dense; at the toy E=32 the masked partial stores are negligible.
    out = pl.pallas_call(
        _self_attention_kernel,
        out_shape=jax.ShapeDtypeStruct((N, Lq, E), query.dtype),
        grid_spec=pltpu.PrefetchScalarGridSpec(
            num_scalar_prefetch=0,
            grid=(N // nb, Lv // tl),
            in_specs=[
                pl.BlockSpec((nb, tl, E), lambda b, l: (b, l, 0)),
                pl.BlockSpec((E, E), lambda b, l: (0, 0)),
            ],
            out_specs=pl.BlockSpec((nb, Lq, E), lambda b, l: (b, 0, 0)),
            scratch_shapes=[pltpu.VMEM((nb, E), jnp.float32)],
        ),
        compiler_params=pltpu.CompilerParams(
            dimension_semantics=("parallel", "arbitrary"),
            vmem_limit_bytes=32 * 1024 * 1024,
        ),
    )(values, wt)
    return out


def _reference(query, key, values, mask, w_fc, heads):
    """Faithful pure-JAX transcription of the PyTorch forward (for validation)."""
    N, Lq, E = query.shape
    D = E // heads
    q = query.reshape(N, Lq, heads, D)
    k = key.reshape(N, key.shape[1], heads, D)
    v = values.reshape(N, values.shape[1], heads, D)
    energy = jnp.einsum('nqhd,nkhd->nhqk', q, k)
    energy = jnp.where(mask == 0, jnp.float32(-1e20), energy)
    attn = jax.nn.softmax(energy / math.sqrt(E), axis=3)
    out = jnp.einsum('nhqk,nlhd->nqhd', attn, v).reshape(N, Lq, E)
    return out @ w_fc.T


if __name__ == "__main__":
    N, seq, E, heads = 2, 8, 32, 4

    key0 = jax.random.PRNGKey(0)
    kq, kk, kv, kw = jax.random.split(key0, 4)

    query = jax.random.normal(kq, (N, seq, E), dtype=jnp.float32)
    key_in = jax.random.normal(kk, (N, seq, E), dtype=jnp.float32)
    values = jax.random.normal(kv, (N, seq, E), dtype=jnp.float32)

    # Deterministic padding-style mask: batch n can attend to the first seq - n keys.
    kpos = jnp.arange(seq)[None, None, None, :]                                   # (1,1,1,Lk)
    mask = (kpos < (seq - jnp.arange(N))[:, None, None, None]).astype(jnp.int32)  # (N,1,1,Lk)

    # fc_out weight, PyTorch nn.Linear default-style init (uniform in +-1/sqrt(fan_in)).
    bound = 1.0 / math.sqrt(E)
    w_fc = jax.random.uniform(kw, (E, E), dtype=jnp.float32, minval=-bound, maxval=bound)
    # TODO(synk): the queries/keys/values nn.Linear layers exist in __init__ but are
    # never applied in forward(), so they intentionally have no kernel-side counterpart.

    out = self_attention_forward(query, key_in, values, mask, w_fc, heads)
    out = jax.block_until_ready(out)

    ref = _reference(query, key_in, values, mask, w_fc, heads)
    assert out.shape == (N, seq, E)
    assert jnp.allclose(out, ref, rtol=1e-5, atol=1e-5), "mismatch vs reference"

    print("KERNEL_OK")
</pallas_src>

<mosaic_0001>
module attributes {stable_mosaic.version = 11 : i64} {
  func.func @_self_attention_kernel(%arg0: i32, %arg1: i32, %arg2: memref<2x8x32xf32, #tpu.memory_space<vmem>>, %arg3: memref<32x32xf32, #tpu.memory_space<vmem>>, %arg4: memref<2x8x32xf32, #tpu.memory_space<vmem>>, %arg5: memref<2x32xf32, #tpu.memory_space<vmem>>) attributes {dimension_semantics = [#tpu.dimension_semantics<parallel>, #tpu.dimension_semantics<arbitrary>], iteration_bounds = array<i64: 1, 1>, scalar_prefetch = 0 : i64, scratch_operands = 1 : i64, tpu.core_type = #tpu.core_type<tc>, window_params = [{transform_indices = @transform_0, window_bounds = array<i64: 2, 8, 32>}, {pipeline_mode = #tpu.pipeline_mode<synchronous>, transform_indices = @transform_1, window_bounds = array<i64: 32, 32>}, {transform_indices = @transform_2, window_bounds = array<i64: 2, 8, 32>}]} {
    %c0_i32 = arith.constant 0 : i32
    %0 = arith.cmpi eq, %arg1, %c0_i32 : i32
    %1 = arith.extui %0 : i1 to i32
    %c0_i32_0 = arith.constant 0 : i32
    %2 = arith.cmpi ne, %1, %c0_i32_0 : i32
    scf.if %2 {
      %cst_9 = arith.constant 0.000000e+00 : f32
      %11 = vector.broadcast %cst_9 : f32 to vector<2x32xf32>
      %c0_10 = arith.constant 0 : index
      %c0_11 = arith.constant 0 : index
      %12 = vector.load %arg5[%c0_10, %c0_11] : memref<2x32xf32, #tpu.memory_space<vmem>>, vector<2x32xf32>
      tpu.vector_store %arg5[%c0_10, %c0_11], %11 {strides = array<i32>} : memref<2x32xf32, #tpu.memory_space<vmem>>, vector<2x32xf32>,
    } else {
    }
    %c0 = arith.constant 0 : index
    %c0_1 = arith.constant 0 : index
    %3 = vector.load %arg5[%c0, %c0_1] : memref<2x32xf32, #tpu.memory_space<vmem>>, vector<2x32xf32>
    %c0_2 = arith.constant 0 : index
    %c0_3 = arith.constant 0 : index
    %c0_4 = arith.constant 0 : index
    %4 = vector.load %arg2[%c0_2, %c0_3, %c0_4] : memref<2x8x32xf32, #tpu.memory_space<vmem>>, vector<2x8x32xf32>
    %cst = arith.constant dense<0.000000e+00> : vector<2x32xf32>
    %5 = vector.multi_reduction <add>, %4, %cst [1] : vector<2x8x32xf32> to vector<2x32xf32>
    %6 = arith.addf %3, %5 : vector<2x32xf32>
    %c0_5 = arith.constant 0 : index
    %c0_6 = arith.constant 0 : index
    %7 = vector.load %arg5[%c0_5, %c0_6] : memref<2x32xf32, #tpu.memory_space<vmem>>, vector<2x32xf32>
    tpu.vector_store %arg5[%c0_5, %c0_6], %6 {strides = array<i32>} : memref<2x32xf32, #tpu.memory_space<vmem>>, vector<2x32xf32>,
    %c0_i32_7 = arith.constant 0 : i32
    %8 = arith.cmpi eq, %arg1, %c0_i32_7 : i32
    %9 = arith.extui %8 : i1 to i32
    %c0_i32_8 = arith.constant 0 : i32
    %10 = arith.cmpi ne, %9, %c0_i32_8 : i32
    scf.if %10 {
      %c0_9 = arith.constant 0 : index
      %c0_10 = arith.constant 0 : index
      %11 = vector.load %arg5[%c0_9, %c0_10] : memref<2x32xf32, #tpu.memory_space<vmem>>, vector<2x32xf32>
      %c0_11 = arith.constant 0 : index
      %c0_12 = arith.constant 0 : index
      %12 = vector.load %arg3[%c0_11, %c0_12] : memref<32x32xf32, #tpu.memory_space<vmem>>, vector<32x32xf32>
      %cst_13 = arith.constant dense<0.000000e+00> : vector<2x32xf32>
      %13 = tpu.matmul %11, %12, %cst_13 {dimension_numbers = #tpu.dot_dimension_numbers<[1], [0], [0], [1], [0, 0, 1, 1], [], []>} : vector<2x32xf32>, vector<32x32xf32>, vector<2x32xf32> -> vector<2x32xf32>
      %14 = vector.shape_cast %13 : vector<2x32xf32> to vector<2x1x32xf32>
      %15 = vector.shape_cast %14 : vector<2x1x32xf32> to vector<2x1x32xf32>
      %16 = vector.broadcast %15 : vector<2x1x32xf32> to vector<2x8x32xf32>
      %c0_14 = arith.constant 0 : index
      %c0_15 = arith.constant 0 : index
      %c0_16 = arith.constant 0 : index
      %17 = vector.load %arg4[%c0_14, %c0_15, %c0_16] : memref<2x8x32xf32, #tpu.memory_space<vmem>>, vector<2x8x32xf32>
      tpu.vector_store %arg4[%c0_14, %c0_15, %c0_16], %16 {strides = array<i32>} : memref<2x8x32xf32, #tpu.memory_space<vmem>>, vector<2x8x32xf32>,
    } else {
    }
    return
  }
  func.func @transform_0(%arg0: i32, %arg1: i32) -> (i32, i32, i32) {
    %c0_i32 = arith.constant 0 : i32
    %c0_i32_0 = arith.constant 0 : i32
    return %arg0, %arg1, %c0_i32 : i32, i32, i32
  }
  func.func @transform_1(%arg0: i32, %arg1: i32) -> (i32, i32) {
    %c0_i32 = arith.constant 0 : i32
    %c0_i32_0 = arith.constant 0 : i32
    %c0_i32_1 = arith.constant 0 : i32
    return %c0_i32, %c0_i32_0 : i32, i32
  }
  func.func @transform_2(%arg0: i32, %arg1: i32) -> (i32, i32, i32) {
    %c0_i32 = arith.constant 0 : i32
    %c0_i32_0 = arith.constant 0 : i32
    %c0_i32_1 = arith.constant 0 : i32
    return %arg0, %c0_i32, %c0_i32_0 : i32, i32, i32
  }
}

</mosaic_0001>

<bundles_post_ra>
// kernel: tpu_custom_call.1
= control target key start
LH: loop header
LB: loop body
LE: loop exit
PB: predicated region body
PF: predicated region fallthrough
CT: control target
= control target key end

     0   :  { %7 = vsyncpa [#allocation4], 0  ;;  %s266_s0 = inlined_call_operand.hbm [shape: f32[2,8,32], index: 0, kind: input, shape index: {}]   ;;  %s267_s1 = inlined_call_operand.hbm [shape: f32[32,32], index: 1, kind: input, shape index: {}]   ;;  %s268_s2 = inlined_call_operand.hbm [shape: f32[2,8,32], index: 2, kind: output, shape index: {}]  }
   0x1   :  { %8 = vsyncpa [#allocation7], 0 }
   0x2   :  { %9 = vsyncpa [#allocation5], 0  ;;  %s14_s11 = sshll.u32 %s266_s0, 4  ;;  %s220_s12 = smov [#allocation3]   ;;  %s15_s11 = int_to_ptr.hbm [resolvable:$true] %s14_s11 }
   0x3   :  { %s16_s13 = sshll.u32 %s220_s12, 4  ;;  %s27_s16 = sshll.u32 %s267_s1, 4  ;;  %s17_s13 = int_to_ptr.vmem [resolvable:$true] %s16_s13  ;;  %s28_s16 = int_to_ptr.hbm [resolvable:$true] %s27_s16 }
   0x4   :  { %s221_s17 = smov 128   ;;  %s222_s18 = smov 8  }
   0x5   :  { %22 = dma.hbm_to_vmem [thread:$0]  %s15_s11, 256, %s17_s13, [#allocation4], %s221_s17, %s221_s17, %s222_s18  }
   0x6   :  { %s223_s19 = smov [#allocation6]  }
   0x7   :  { %s29_s20 = sshll.u32 %s223_s19, 4  ;;  %s30_s20 = int_to_ptr.vmem [resolvable:$true] %s29_s20 }
   0x8   :  { %35 = dma.hbm_to_vmem [thread:$0]  %s28_s16, 512, %s30_s20, [#allocation7], %s221_s17, %s221_s17, %s222_s18  }
   0x9   :  { %214 = dma.done.wait [#allocation4], 256  }
   0xa   :  { %215 = vsyncadd [#allocation4], 4294967040 }
   0xb   :  { %216 = dma.done.wait [#allocation7], 512  }
   0xc   :  { %217 = vsyncadd [#allocation7], 4294966784  ;;  %vm48_vm0 = vcmask 254976   ;;  %v224_v0 = vmov 0.0   ;;  %vm53_vm1 = vcmask 261120   ;;  %v83_v1 = vld [vmem:[#allocation6 + $0x18] sm:$0xff] }
   0xd   :  { %49 = vst.msk [vmem:[#allocation2] sm:$0x3] %vm48_vm0, %v224_v0  ;;  %v82_v2 = vld [vmem:[#allocation6 + $0x10] sm:$0xff]  ;;  %99 = vmatpush.msra.mxu0 %v83_v1  ;;  %v81_v4 = vld [vmem:[#allocation6 + $0x8] sm:$0xff]  ;;  %v52_v5 = vld [vmem:[#allocation3 + $0x8] sm:$0xff]  ;;  %vm70_vm2 = vcmask 1041409  }
   0xe   :  { %v51_v3 = vld [vmem:[#allocation3] sm:$0xff]  ;;  %v61_v8 = vsel %vm53_vm1, %v52_v5, 0.0  ;;  %v80_v9 = vld [vmem:[#allocation6] sm:$0xff]  ;;  %s225_s0 = smov [#allocation8]   ;;  %s121_s23 = sshll.u32 %s268_s2, 4  ;;  %s122_s23 = int_to_ptr.hbm [resolvable:$true] %s121_s23 }
   0xf   :  { %v54_v6 = vsel %vm53_vm1, %v51_v3, 0.0  ;;  %100 = vmatpush.msra.mxu0 %v82_v2  ;;  %v62_v10 = vrot.slane %v61_v8, 4  ;;  %s119_s1 = sshll.u32 %s225_s0, 4  ;;  %s120_s1 = int_to_ptr.vmem [resolvable:$true] %s119_s1 }
  0x10   :  { %v55_v7 = vrot.slane %v54_v6, 4 }
  0x11   :  { %101 = vmatpush.msra.mxu0 %v81_v4  ;;  %v63_v12 = vadd.f32 %v62_v10, %v61_v8 }
  0x12   :  { %v56_v11 = vadd.f32 %v55_v7, %v54_v6 }
  0x13   :  { %102 = vmatpush.msra.mxu0 %v80_v9  ;;  %v64_v14 = vrot.slane %v63_v12, 2 }
  0x14   :  { %v57_v13 = vrot.slane %v56_v11, 2  ;;  %v50_v20 = vld [vmem:[#allocation2] sm:$0x3] }
  0x15   :  { %v65_v16 = vadd.f32 %v64_v14, %v63_v12 }
  0x16   :  { %v58_v15 = vadd.f32 %v57_v13, %v56_v11 }
  0x17   :  { %v66_v18 = vrot.slane %v65_v16, 1 }
  0x18   :  { %v59_v17 = vrot.slane %v58_v15, 1 }
  0x19   :  { %v67_v21 = vadd.f32 %v66_v18, %v65_v16 }
  0x1a   :  { %v60_v19 = vadd.f32 %v59_v17, %v58_v15 }
  0x1c   :  { %v71_v22 = vsel %vm70_vm2, %v67_v21, %v60_v19 }
  0x1d   :  { %v73_v23 = vadd.f32 %v71_v22, %v50_v20 }
  0x1f   :  { %75 = vst.msk [vmem:[#allocation2] sm:$0x3] %vm48_vm0, %v73_v23 }
  0x26   :  { %v79_v24 = vld [vmem:[#allocation2] sm:$0x3] }
  0x27   :  { %135 = vmatmul.msk.f32.vlgmr.msra.gmra.mxu0 %vm53_vm1, %v79_v24 }
  0xa4   :  { %v104_v25 = vpop.f32.mrf.mxu0 }
  0xa5   :  { %v108_v26 = vrot.slane %v104_v25, 1  ;;  %v109_v27 = vperm.slane %v104_v25, 0 }
  0xa7   :  { %v110_v28 = vperm.slane %v108_v26, 0  ;;  %113 = vst.msk [vmem:[#allocation8] sm:$0xff] %vm53_vm1, %v109_v27 }
  0xa9   :  { %114 = vst.msk [vmem:[#allocation8 + $0x8] sm:$0xff] %vm53_vm1, %v110_v28 }
  0xaa   :  { %127 = dma.vmem_to_hbm [thread:$0]  %s120_s1, 256, %s122_s23, [#allocation5], %s221_s17, %s221_s17, %s222_s18  }
  0xab   :  { %218 = dma.done.wait [#allocation5], 256  }
  0xac   :  { %219 = vsyncadd [#allocation5], 4294967040 }
  0xad   :  { %132 = vsyncpa [#allocation4], 1 }
  0xae   :  { %133 = vsyncpa [#allocation7], 1 }
  0xaf   :  { %134 = vsyncpa [#allocation5], 1 }

</bundles_post_ra>
